<compile_context>
chip_gen: v5e
topology: v5e:2x2
jax: 0.10.0
libtpu: 0.0.40
codegen_flags: <defaults>
</compile_context>

<pallas_src>
from collections import OrderedDict

import jax
import jax.numpy as jnp
from jax.experimental import pallas as pl
from jax.experimental.pallas import tpu as pltpu


# ----------------------------------------------------------------------------
# Small integer helpers (wrapper-side tiling / padding math)
# ----------------------------------------------------------------------------
def _cdiv(a, b):
    return -(-a // b)


def _round_up(a, m):
    return _cdiv(a, m) * m


def _split_dim(dim, max_tile, align):
    """Balanced split: returns (tile, padded_dim, n_blocks) with tile a
    multiple of `align`, tile <= max(max_tile, align), n_blocks * tile >= dim,
    minimizing padding for that block count."""
    d = _round_up(dim, align)
    n = _cdiv(d, max(max_tile, align))
    tile = _round_up(_cdiv(d, n), align)
    return tile, n * tile, n


def _vmem_limit_bytes():
    # Generation-aware VMEM budget: ~3/4 of physical, capped at 96 MiB.
    # v5e/v6e (128 MiB physical) -> 96 MiB; v7x (64 MiB per TC) -> 48 MiB.
    try:
        cap = int(pltpu.get_tpu_info().vmem_capacity_bytes)
    except Exception:
        cap = 64 * 1024 * 1024  # assume the most restrictive (v7x per-TC)
    return min(cap * 3 // 4, 96 * 1024 * 1024)


_SMALL_LIMIT_BYTES = 4 * 1024 * 1024  # single-VMEM-block threshold


# ----------------------------------------------------------------------------
# Pallas kernels: linear forward  y = x @ W + b
# ----------------------------------------------------------------------------
def _linear_kernel_single(x_ref, w_ref, b_ref, o_ref):
    # In-kernel bf16 cast of activations (VPU cast hidden under MXU work),
    # MXU matmul with f32 accumulation, bias added in f32.
    acc = jnp.dot(x_ref[...].astype(jnp.bfloat16), w_ref[...],
                  preferred_element_type=jnp.float32)
    o_ref[...] = (acc + b_ref[...]).astype(o_ref.dtype)


def _linear_kernel_tiled(x_ref, w_ref, b_ref, o_ref):
    # Accumulate directly into the resident f32 output block (no VMEM scratch,
    # no epilogue copy).  Bias is folded in at the first K step.
    @pl.when(pl.program_id(2) == 0)
    def _():
        o_ref[...] = jnp.broadcast_to(b_ref[...], o_ref.shape)

    o_ref[...] += jnp.dot(x_ref[...].astype(jnp.bfloat16), w_ref[...],
                          preferred_element_type=jnp.float32)


# ----------------------------------------------------------------------------
# Wrapper
# ----------------------------------------------------------------------------
def linear_forward(x, w, b, *, tm=512, tn=512, tk=1024):
    """y = x @ w + b on the MXU.

    x: [M, K] float32 activations (cast to bf16 inside the kernel),
    w: [K, N] bfloat16 weights, b: [N] float32 bias.  Output: float32 [M, N].
    """
    M, K = x.shape
    K2, N = w.shape
    assert K == K2, f"shape mismatch: {x.shape} @ {w.shape}"
    out_dtype = jnp.float32
    b2d = b.reshape(1, N).astype(jnp.float32)

    x_bytes = M * K * 4
    w_bytes = K * N * 2
    b_bytes = N * 4
    o_bytes = M * N * 4
    total_bytes = x_bytes + w_bytes + b_bytes + o_bytes

    if total_bytes <= _SMALL_LIMIT_BYTES:
        cost = pl.CostEstimate(flops=2 * M * N * K, transcendentals=0,
                               bytes_accessed=total_bytes)
        if M % 16 == 0 and M >= 16:
            # 1-D "parallel" grid over M so both TensorCores (v7x) get work.
            half = M // 2
            return pl.pallas_call(
                _linear_kernel_single,
                out_shape=jax.ShapeDtypeStruct((M, N), out_dtype),
                grid=(2,),
                in_specs=[
                    pl.BlockSpec((half, K), lambda i: (i, 0)),
                    pl.BlockSpec((K, N), lambda i: (0, 0)),
                    pl.BlockSpec((1, N), lambda i: (0, 0)),
                ],
                out_specs=pl.BlockSpec((half, N), lambda i: (i, 0)),
                compiler_params=pltpu.CompilerParams(
                    dimension_semantics=("parallel",)),
                cost_estimate=cost,
            )(x, w, b2d)
        # Tiny / oddly shaped: whole arrays resident in VMEM, no grid.
        return pl.pallas_call(
            _linear_kernel_single,
            out_shape=jax.ShapeDtypeStruct((M, N), out_dtype),
            in_specs=[
                pl.BlockSpec(memory_space=pltpu.MemorySpace.VMEM),
                pl.BlockSpec(memory_space=pltpu.MemorySpace.VMEM),
                pl.BlockSpec(memory_space=pltpu.MemorySpace.VMEM),
            ],
            out_specs=pl.BlockSpec(memory_space=pltpu.MemorySpace.VMEM),
            cost_estimate=cost,
        )(x, w, b2d)

    # --- tiled path: 3-D grid, direct f32-output accumulation, padding for
    #     non-aligned problems so they stay on the fast path ---
    tm, Mp, gm = _split_dim(M, tm, 8)
    tn, Np, gn = _split_dim(N, tn, 128)
    tk, Kp, gk = _split_dim(K, tk, 128)

    if (Mp, Kp) != (M, K):
        x = jnp.pad(x, ((0, Mp - M), (0, Kp - K)))
    if (Kp, Np) != (K, N):
        w = jnp.pad(w, ((0, Kp - K), (0, Np - N)))
    if Np != N:
        b2d = jnp.pad(b2d, ((0, 0), (0, Np - N)))

    # Actual tiled HBM traffic: x re-read gn times, w/b re-read gm times,
    # output written once per (i, j) tile.
    bytes_accessed = (Mp * Kp * 4 * gn + Kp * Np * 2 * gm + Np * 4 * gm
                      + Mp * Np * 4)
    cost = pl.CostEstimate(flops=2 * Mp * Np * Kp, transcendentals=0,
                           bytes_accessed=bytes_accessed)

    out = pl.pallas_call(
        _linear_kernel_tiled,
        out_shape=jax.ShapeDtypeStruct((Mp, Np), out_dtype),
        grid_spec=pltpu.PrefetchScalarGridSpec(
            num_scalar_prefetch=0,
            grid=(gm, gn, gk),
            in_specs=[
                pl.BlockSpec((tm, tk), lambda i, j, k: (i, k)),
                pl.BlockSpec((tk, tn), lambda i, j, k: (k, j)),
                pl.BlockSpec((1, tn), lambda i, j, k: (0, j)),
            ],
            out_specs=pl.BlockSpec((tm, tn), lambda i, j, k: (i, j)),
        ),
        compiler_params=pltpu.CompilerParams(
            # M/N parallel (megacore / v7x 2-TC sharding), K reduction arbitrary.
            dimension_semantics=("parallel", "parallel", "arbitrary"),
            vmem_limit_bytes=_vmem_limit_bytes(),
        ),
        cost_estimate=cost,
    )(x, w, b2d)

    if (Mp, Np) != (M, N):
        out = out[:M, :N]
    return out


# ----------------------------------------------------------------------------
# Synthetic inner module (the "twice-wrapped" module) + DDP stub + proxy
# ----------------------------------------------------------------------------
class InnerLinearModule:
    """The plain module that DDP would wrap.  Holds params; forward = Pallas."""

    def __init__(self, in_features, out_features, key):
        kw, kb = jax.random.split(key)
        # Params stored in bf16 (halves HBM traffic; native MXU input format).
        self.weight = (jax.random.normal(kw, (in_features, out_features),
                                         jnp.float32) * 0.05).astype(jnp.bfloat16)
        # Bias kept in f32 and added in the f32 accumulator.
        self.bias = jax.random.normal(kb, (out_features,), jnp.float32) * 0.05
        self.xyz = "hello world"  # custom attribute, proxied through wrappers

    def forward(self, x):
        # x stays f32; the bf16 cast happens inside the Pallas kernel.
        return linear_forward(x, self.weight, self.bias)

    def __call__(self, x):
        return self.forward(x)

    def state_dict(self):
        return OrderedDict([("weight", self.weight), ("bias", self.bias)])

    def load_state_dict(self, sd):
        self.weight = sd["weight"]
        self.bias = sd["bias"]


class DDPStub:
    """Stands in for DistributedDataParallel: wraps `module`, forwards calls."""
    # TODO(synk): real DDP gradient bucketing/all-reduce has no forward-pass
    # compute and is not represented here.

    def __init__(self, module):
        self.module = module

    def __call__(self, *args, **kwargs):
        return self.module(*args, **kwargs)


class ModuleProxyWrapper:
    """JAX-side replica of the PyTorch ModuleProxyWrapper semantics."""

    def __init__(self, module):
        assert hasattr(module, "module"), (
            "ModuleProxyWrapper expects input to wrap another module")
        object.__setattr__(self, "module", module)  # bypass __getattr__ in init

    def __getattr__(self, name):
        # Forward missing attributes to the twice-wrapped module.
        module = object.__getattribute__(self, "module")
        try:
            return getattr(module, name)
        except AttributeError:
            return getattr(module.module, name)

    def state_dict(self, *args, **kwargs):
        return self.module.module.state_dict(*args, **kwargs)

    def load_state_dict(self, *args, **kwargs):
        return self.module.module.load_state_dict(*args, **kwargs)

    def forward(self, *args, **kwargs):
        return self.module(*args, **kwargs)

    def __call__(self, *args, **kwargs):
        return self.forward(*args, **kwargs)


# ----------------------------------------------------------------------------
# Reference
# ----------------------------------------------------------------------------
def _ref_linear(x_f32, w_bf16, b_f32):
    xb = x_f32.astype(jnp.bfloat16).astype(jnp.float32)
    wf = w_bf16.astype(jnp.float32)
    return jnp.dot(xb, wf, precision=jax.lax.Precision.HIGHEST) + b_f32


# ----------------------------------------------------------------------------
# Main
# ----------------------------------------------------------------------------
if __name__ == "__main__":
    key = jax.random.PRNGKey(0)
    k1, k2, k3, k4, k5, k6, k7, k8 = jax.random.split(key, 8)

    # --- 1. small, lane-dense case: proxy semantics + no-grid VMEM-block path ---
    batch, hidden = 8, 128
    inner = InnerLinearModule(hidden, hidden, k1)
    wrapped = ModuleProxyWrapper(DDPStub(inner))

    # Proxy semantics checks (attribute + state_dict forwarding).
    assert wrapped.xyz == "hello world"
    assert list(wrapped.state_dict().keys()) == list(inner.state_dict().keys())

    x = jax.random.normal(k2, (batch, hidden), jnp.float32)
    y = jax.block_until_ready(wrapped(x))
    y_ref = _ref_linear(x, inner.weight, inner.bias)
    assert y.shape == (batch, hidden)
    assert jnp.allclose(y, y_ref, atol=1e-3, rtol=1e-3)

    # --- 2. medium case: single-block path with 2-way parallel M split
    #        (keeps both v7x TensorCores busy) ---
    M, K, N = 256, 512, 256
    inner2 = InnerLinearModule(K, N, k3)
    wrapped2 = ModuleProxyWrapper(DDPStub(inner2))
    x2 = jax.random.normal(k4, (M, K), jnp.float32)
    y2 = jax.block_until_ready(wrapped2(x2))
    assert y2.shape == (M, N)
    assert jnp.allclose(y2, _ref_linear(x2, inner2.weight, inner2.bias),
                        atol=1e-3, rtol=1e-3)

    # --- 3. larger aligned case: tiled 3-D grid with K accumulation ---
    M, K, N = 512, 2048, 1024
    inner3 = InnerLinearModule(K, N, k5)
    wrapped3 = ModuleProxyWrapper(DDPStub(inner3))
    x3 = jax.random.normal(k6, (M, K), jnp.float32)
    y3 = jax.block_until_ready(wrapped3(x3))
    assert y3.shape == (M, N)
    assert jnp.allclose(y3, _ref_linear(x3, inner3.weight, inner3.bias),
                        atol=2e-2, rtol=2e-3)

    # --- 4. unaligned case: padded onto the tiled path (no VMEM-block cliff) ---
    M, K, N = 1032, 1032, 520
    inner4 = InnerLinearModule(K, N, k7)
    wrapped4 = ModuleProxyWrapper(DDPStub(inner4))
    x4 = jax.random.normal(k8, (M, K), jnp.float32)
    y4 = jax.block_until_ready(wrapped4(x4))
    assert y4.shape == (M, N)
    assert jnp.allclose(y4, _ref_linear(x4, inner4.weight, inner4.bias),
                        atol=2e-2, rtol=2e-3)

    print("KERNEL_OK")
</pallas_src>

<mosaic_0001>
module attributes {stable_mosaic.version = 11 : i64} {
  func.func @_linear_kernel_single(%arg0: memref<8x128xf32, #tpu.memory_space<vmem>>, %arg1: memref<128x128xbf16, #tpu.memory_space<vmem>>, %arg2: memref<1x128xf32, #tpu.memory_space<vmem>>, %arg3: memref<8x128xf32, #tpu.memory_space<vmem>>) attributes {dimension_semantics = [], scalar_prefetch = 0 : i64, scratch_operands = 0 : i64, tpu.core_type = #tpu.core_type<tc>} {
    %c0 = arith.constant 0 : index
    %c0_0 = arith.constant 0 : index
    %0 = vector.load %arg0[%c0, %c0_0] : memref<8x128xf32, #tpu.memory_space<vmem>>, vector<8x128xf32>
    %1 = arith.truncf %0 : vector<8x128xf32> to vector<8x128xbf16>
    %c0_1 = arith.constant 0 : index
    %c0_2 = arith.constant 0 : index
    %2 = vector.load %arg1[%c0_1, %c0_2] : memref<128x128xbf16, #tpu.memory_space<vmem>>, vector<128x128xbf16>
    %cst = arith.constant dense<0.000000e+00> : vector<8x128xf32>
    %3 = tpu.matmul %1, %2, %cst {dimension_numbers = #tpu.dot_dimension_numbers<[1], [0], [0], [1], [0, 0, 1, 1], [], []>} : vector<8x128xbf16>, vector<128x128xbf16>, vector<8x128xf32> -> vector<8x128xf32>
    %c0_3 = arith.constant 0 : index
    %c0_4 = arith.constant 0 : index
    %4 = vector.load %arg2[%c0_3, %c0_4] : memref<1x128xf32, #tpu.memory_space<vmem>>, vector<1x128xf32>
    %5 = vector.broadcast %4 : vector<1x128xf32> to vector<8x128xf32>
    %6 = arith.addf %3, %5 : vector<8x128xf32>
    %c0_5 = arith.constant 0 : index
    %c0_6 = arith.constant 0 : index
    %7 = vector.load %arg3[%c0_5, %c0_6] : memref<8x128xf32, #tpu.memory_space<vmem>>, vector<8x128xf32>
    tpu.vector_store %arg3[%c0_5, %c0_6], %6 {strides = array<i32>} : memref<8x128xf32, #tpu.memory_space<vmem>>, vector<8x128xf32>,
    return
  }
}

</mosaic_0001>

<bundles_post_ra>
// kernel: tpu_custom_call.1
= control target key start
LH: loop header
LB: loop body
LE: loop exit
PB: predicated region body
PF: predicated region fallthrough
CT: control target
= control target key end

     0   :  { %8 = vsyncpa [#allocation3], 0  ;;  %s308_s0 = inlined_call_operand.hbm [shape: f32[8,128], index: 0, kind: input, shape index: {}]   ;;  %s309_s1 = inlined_call_operand.hbm [shape: bf16[128,128], index: 1, kind: input, shape index: {}]   ;;  %s310_s2 = inlined_call_operand.vmem [shape: f32[1,128], index: 2, kind: input, shape index: {}]   ;;  %s311_s3 = inlined_call_operand.hbm [shape: f32[8,128], index: 3, kind: output, shape index: {}]  }
   0x1   :  { %9 = vsyncpa [#allocation6], 0 }
   0x2   :  { %10 = vsyncpa [#allocation4], 0  ;;  %s16_s14 = sshll.u32 %s308_s0, 4  ;;  %s271_s15 = smov [#allocation2]   ;;  %s17_s14 = int_to_ptr.hbm [resolvable:$true] %s16_s14 }
   0x3   :  { %s18_s16 = sshll.u32 %s271_s15, 4  ;;  %s26_s19 = sshll.u32 %s309_s1, 4  ;;  %s19_s16 = int_to_ptr.vmem [resolvable:$true] %s18_s16  ;;  %s27_s19 = int_to_ptr.hbm [resolvable:$true] %s26_s19 }
   0x4   :  { %21 = dma.hbm_to_vmem [thread:$0]  %s17_s14, 128, %s19_s16, [#allocation3]  }
   0x5   :  { %s272_s20 = smov [#allocation5]   ;;  %s273_s22 = smov 64  }
   0x6   :  { %s28_s21 = sshll.u32 %s272_s20, 4  ;;  %s274_s23 = smov 4   ;;  %s29_s21 = int_to_ptr.vmem [resolvable:$true] %s28_s21 }
   0x7   :  { %34 = dma.hbm_to_vmem [thread:$0]  %s27_s19, 1024, %s29_s21, [#allocation6], %s273_s22, %s273_s22, %s274_s23  }
   0x8   :  { %265 = dma.done.wait [#allocation3], 128  }
   0x9   :  { %266 = vsyncadd [#allocation3], 4294967168 }
   0xa   :  { %267 = dma.done.wait [#allocation6], 1024  }
   0xb   :  { %268 = vsyncadd [#allocation6], 4294966272  ;;  %v186_v0 = vld [vmem:[#allocation5 + $0x38] sm:$0xff]  ;;  %v185_v1 = vld [vmem:[#allocation5 + $0x30] sm:$0xff]  ;;  %s275_s24 = smov [#allocation7]   ;;  %s136_s28 = sshll.u32 %s311_s3, 4  ;;  %s137_s28 = int_to_ptr.hbm [resolvable:$true] %s136_s28 }
   0xc   :  { %115 = vmatpush.bf16.msra.mxu0 %v186_v0  ;;  %v184_v2 = vld [vmem:[#allocation5 + $0x28] sm:$0xff]  ;;  %v183_v3 = vld [vmem:[#allocation5 + $0x20] sm:$0xff]  ;;  %v182_v4 = vld [vmem:[#allocation5 + $0x18] sm:$0xff]  ;;  %s134_s25 = sshll.u32 %s275_s24, 4  ;;  %s135_s25 = int_to_ptr.vmem [resolvable:$true] %s134_s25 }
   0xd   :  { %v181_v5 = vld [vmem:[#allocation5 + $0x10] sm:$0xff]  ;;  %v180_v6 = vld [vmem:[#allocation5 + $0x8] sm:$0xff]  ;;  %v179_v7 = vld [vmem:[#allocation5] sm:$0xff] }
   0xe   :  { %v45_v8 = vld [vmem:[#allocation2] sm:$0xff] }
   0xf   :  { %v46_v9 = vpack.c.bf16 %v45_v8, %v45_v8  ;;  %v192_v10 = vld [vmem:[%s310_s2] ss:$0 sm:$0xff] }
  0x10   :  { %116 = vmatpush.bf16.msra.mxu0 %v185_v1 }
  0x14   :  { %117 = vmatpush.bf16.msra.mxu0 %v184_v2 }
  0x18   :  { %118 = vmatpush.bf16.msra.mxu0 %v183_v3 }
  0x1c   :  { %119 = vmatpush.bf16.msra.mxu0 %v182_v4 }
  0x20   :  { %120 = vmatpush.bf16.msra.mxu0 %v181_v5 }
  0x24   :  { %121 = vmatpush.bf16.msra.mxu0 %v180_v6 }
  0x28   :  { %122 = vmatpush.bf16.msra.mxu0 %v179_v7 }
  0x2b   :  { %123 = vmatmul.bf16.vlgmr.msra.gmra.mxu0 %v46_v9 }
  0xa8   :  { %v124_v11 = vpop.f32.mrf.mxu0 }
  0xa9   :  { %v125_v12 = vadd.f32 %v192_v10, %v124_v11 }
  0xab   :  { %128 = vst [vmem:[#allocation7] sm:$0xff] %v125_v12 }
  0xac   :  { %139 = dma.vmem_to_hbm [thread:$0]  %s135_s25, 128, %s137_s28, [#allocation4]  }
  0xb0   :  { %v126_v13 = vpop.f32.mrf.mxu0 }
  0xb1   :  { %269 = dma.done.wait [#allocation4], 128  }
  0xb2   :  { %270 = vsyncadd [#allocation4], 4294967168 }
  0xb3   :  { %144 = vsyncpa [#allocation3], 1 }
  0xb4   :  { %145 = vsyncpa [#allocation6], 1 }
  0xb5   :  { %146 = vsyncpa [#allocation4], 1 }

</bundles_post_ra>
